<compile_context>
chip_gen: v6e
topology: v6e:2x2x1
jax: 0.10.0
libtpu: 0.0.40
codegen_flags: <defaults>
</compile_context>

<pallas_src>
import functools

import jax
import jax.numpy as jnp
from jax.experimental import pallas as pl
from jax.experimental.pallas import tpu as pltpu

GROUPS = 8
EPS = 1e-5  # PyTorch GroupNorm default


def _align_kernel(pt_ref, w_ref, aux_ref, mt_ref, o_ref,
                  *, spatial, chans_per_group, groups):
    """One sample per grid step: conv matmul + GroupNorm + ReLU, fully fused.

    pt_ref  : (1, K, P)      im2col patches for this sample (K = Cin*9, P = OH*OW)
    w_ref   : (Cout, K)      conv weight (resident across the grid)
    aux_ref : (Cout, 3 + G)  f32 columns [bias, gamma, beta, channel->group one-hot]
    mt_ref  : (G, Cout)      f32 group->channel one-hot (transpose of aux[:, 3:])
    o_ref   : (1, Cout, P)   output block for this sample
    """
    # ---- convolution: one MXU matmul (bf16 operands, f32 accumulation) ----
    y = jnp.dot(w_ref[...], pt_ref[0], preferred_element_type=jnp.float32)  # (Cout, P)

    b = aux_ref[:, 0:1]                 # (Cout, 1)
    gamma = aux_ref[:, 1:2]             # (Cout, 1)
    beta = aux_ref[:, 2:3]              # (Cout, 1)
    mb = aux_ref[:, 3:3 + groups]       # (Cout, G) one-hot: channel -> group

    y = y + b                           # conv bias: VPU column broadcast

    # ---- GroupNorm statistics (all f32) ----
    # Per-channel sums: lane (XLU) reductions -- no full-plane matmuls.
    s1 = jnp.sum(y, axis=-1, keepdims=True)        # (Cout, 1)
    s2 = jnp.sum(y * y, axis=-1, keepdims=True)    # (Cout, 1)

    # Per-group stats via tiny one-hot dots ((G,Cout)x(Cout,1): negligible MXU time).
    cnt = jnp.float32(spatial * chans_per_group)
    mean_g = jnp.dot(mt_ref[...], s1, preferred_element_type=jnp.float32) / cnt  # (G, 1)
    e2_g = jnp.dot(mt_ref[...], s2, preferred_element_type=jnp.float32) / cnt    # (G, 1)
    # TODO(synk): for production spatial sizes use a two-pass (subtract-mean)
    # formulation; E[x^2] - mean^2 is cancellation-prone (clamped here).
    var_g = jnp.maximum(e2_g - mean_g * mean_g, 0.0)
    rstd_g = jax.lax.rsqrt(var_g + EPS)

    # Broadcast group stats back to channels (tiny (Cout,G)x(G,1) dots).
    mean_c = jnp.dot(mb, mean_g, preferred_element_type=jnp.float32)   # (Cout, 1)
    rstd_c = jnp.dot(mb, rstd_g, preferred_element_type=jnp.float32)   # (Cout, 1)

    # ---- fused affine + ReLU epilogue: per-channel column broadcast ----
    scale = rstd_c * gamma              # (Cout, 1)
    shift = beta - mean_c * scale       # (Cout, 1)
    o_ref[0] = jnp.maximum(y * scale + shift, 0.0).astype(o_ref.dtype)


def high_res_alignment(x_nchw, w_oihw, b, gamma, beta, target_size,
                       matmul_dtype=jnp.bfloat16):
    """Conv2d(3x3, stride, pad=1) -> GroupNorm(8) -> ReLU, one fused Pallas kernel.

    x_nchw: (N, Cin, H, W). w_oihw: (Cout, Cin, 3, 3). Returns (N, Cout, OH, OW).
    matmul_dtype=bfloat16 (default) feeds the MXU natively; stats stay float32.
    """
    N, Cin, H, W = x_nchw.shape
    Cout = w_oihw.shape[0]
    OH, OW = target_size
    assert Cout % GROUPS == 0, "out_channels must be divisible by num_groups"
    assert H % OH == 0 and W % OW == 0, "input_size must divide by target_size"
    sh, sw = H // OH, W // OW
    P = OH * OW
    K = Cin * 9
    Cg = Cout // GROUPS

    # --- host glue: im2col, kept in NCHW (no NHWC round-trip, no output transpose) ---
    # TODO(synk): for production sizes move im2col into the kernel (DMA an activation
    # tile and accumulate 9 shifted (Cout,Cin)x(Cin,tile) dots) and tile P with a
    # two-pass GroupNorm so blocks fit v7x's 64 MiB VMEM.
    xp = jnp.pad(x_nchw.astype(jnp.float32), ((0, 0), (0, 0), (1, 1), (1, 1)))
    taps = []
    for kh in range(3):
        for kw in range(3):
            taps.append(xp[:, :, kh:kh + sh * (OH - 1) + 1:sh,
                               kw:kw + sw * (OW - 1) + 1:sw])     # (N, Cin, OH, OW)
    # (N, Cin, 9, OH, OW) -> (N, K, P); K index = cin*9 + kh*3 + kw matches OIHW flatten.
    patches = jnp.stack(taps, axis=2).reshape(N, K, P).astype(matmul_dtype)

    w_mat = w_oihw.reshape(Cout, K).astype(matmul_dtype)          # (Cout, K)

    # Pack bias/gamma/beta + channel->group one-hot into a single small f32 input.
    ch_group = jnp.arange(Cout, dtype=jnp.int32) // Cg
    mb = (ch_group[:, None] == jnp.arange(GROUPS, dtype=jnp.int32)[None, :]
          ).astype(jnp.float32)                                   # (Cout, G)
    aux = jnp.concatenate(
        [b.reshape(Cout, 1), gamma.reshape(Cout, 1), beta.reshape(Cout, 1), mb],
        axis=1).astype(jnp.float32)                               # (Cout, 3 + G)
    mt = mb.T                                                     # (G, Cout)

    kernel = functools.partial(_align_kernel, spatial=P,
                               chans_per_group=Cg, groups=GROUPS)

    cost = pl.CostEstimate(
        flops=2 * N * Cout * K * P,
        transcendentals=0,
        bytes_accessed=(patches.size * patches.dtype.itemsize
                        + w_mat.size * w_mat.dtype.itemsize
                        + N * Cout * P * 4))

    out = pl.pallas_call(
        kernel,
        out_shape=jax.ShapeDtypeStruct((N, Cout, P), jnp.float32),
        grid=(N,),   # one sample per step; independent -> shard across TensorCores
        in_specs=[
            pl.BlockSpec((1, K, P), lambda n: (n, 0, 0)),
            pl.BlockSpec((Cout, K), lambda n: (0, 0)),
            pl.BlockSpec((Cout, 3 + GROUPS), lambda n: (0, 0)),
            pl.BlockSpec((GROUPS, Cout), lambda n: (0, 0)),
        ],
        out_specs=pl.BlockSpec((1, Cout, P), lambda n: (n, 0, 0)),
        compiler_params=pltpu.CompilerParams(
            dimension_semantics=("parallel",)),
        cost_estimate=cost,
    )(patches, w_mat, aux, mt)

    # (N, Cout, P) -> (N, Cout, OH, OW): contiguous reshape, no transpose.
    return out.reshape(N, Cout, OH, OW)


def _reference(x, w, b, gamma, beta, target_size):
    N, Cin, H, W = x.shape
    OH, OW = target_size
    sh, sw = H // OH, W // OW
    Cout = w.shape[0]
    y = jax.lax.conv_general_dilated(
        x, w, window_strides=(sh, sw), padding=((1, 1), (1, 1)),
        dimension_numbers=("NCHW", "OIHW", "NCHW"),
    ) + b.reshape(1, -1, 1, 1)
    yg = y.reshape(N, GROUPS, Cout // GROUPS, OH, OW)
    mean = yg.mean(axis=(2, 3, 4), keepdims=True)
    var = ((yg - mean) ** 2).mean(axis=(2, 3, 4), keepdims=True)
    yn = ((yg - mean) * jax.lax.rsqrt(var + EPS)).reshape(N, Cout, OH, OW)
    return jnp.maximum(yn * gamma.reshape(1, -1, 1, 1) + beta.reshape(1, -1, 1, 1), 0.0)


if __name__ == "__main__":
    # Small shapes consistent with the module: in_channels=4, out_channels=16
    # (divisible by 8 groups), input_size=(16,16), target_size=(8,8) -> stride (2,2).
    N, Cin, H, W = 2, 4, 16, 16
    Cout = 16
    target_size = (8, 8)

    key = jax.random.PRNGKey(0)
    kx, kw, kb, kg, kbe = jax.random.split(key, 5)
    x = jax.random.normal(kx, (N, Cin, H, W), dtype=jnp.float32)
    w = 0.1 * jax.random.normal(kw, (Cout, Cin, 3, 3), dtype=jnp.float32)
    b = 0.1 * jax.random.normal(kb, (Cout,), dtype=jnp.float32)
    gamma = 1.0 + 0.1 * jax.random.normal(kg, (Cout,), dtype=jnp.float32)
    beta = 0.1 * jax.random.normal(kbe, (Cout,), dtype=jnp.float32)

    ref = _reference(x, w, b, gamma, beta, target_size)

    # f32 matmul path: tight tolerance vs the f32 reference.
    out_f32 = jax.block_until_ready(
        high_res_alignment(x, w, b, gamma, beta, target_size,
                           matmul_dtype=jnp.float32))
    assert out_f32.shape == (N, Cout, target_size[0], target_size[1])
    assert jnp.allclose(out_f32, ref, atol=1e-4, rtol=1e-4), "f32 path mismatch"

    # Default bf16 matmul path (MXU-native): tolerance loosened for bf16 conv inputs.
    out_bf16 = jax.block_until_ready(
        high_res_alignment(x, w, b, gamma, beta, target_size))
    assert out_bf16.shape == (N, Cout, target_size[0], target_size[1])
    assert jnp.allclose(out_bf16, ref, atol=3e-2, rtol=3e-2), "bf16 path mismatch"

    print("KERNEL_OK")
</pallas_src>

<mosaic_0001>
module attributes {stable_mosaic.version = 11 : i64} {
  func.func @_align_kernel(%arg0: i32, %arg1: memref<1x36x64xf32, #tpu.memory_space<vmem>>, %arg2: memref<16x36xf32, #tpu.memory_space<vmem>>, %arg3: memref<16x11xf32, #tpu.memory_space<vmem>>, %arg4: memref<8x16xf32, #tpu.memory_space<vmem>>, %arg5: memref<1x16x64xf32, #tpu.memory_space<vmem>>) attributes {dimension_semantics = [#tpu.dimension_semantics<parallel>], iteration_bounds = array<i64: 2>, scalar_prefetch = 0 : i64, scratch_operands = 0 : i64, tpu.core_type = #tpu.core_type<tc>, window_params = [{transform_indices = @transform_0, window_bounds = array<i64: 1, 36, 64>}, {pipeline_mode = #tpu.pipeline_mode<synchronous>, transform_indices = @transform_1, window_bounds = array<i64: 16, 36>}, {pipeline_mode = #tpu.pipeline_mode<synchronous>, transform_indices = @transform_2, window_bounds = array<i64: 16, 11>}, {pipeline_mode = #tpu.pipeline_mode<synchronous>, transform_indices = @transform_3, window_bounds = array<i64: 8, 16>}, {transform_indices = @transform_4, window_bounds = array<i64: 1, 16, 64>}]} {
    %c0 = arith.constant 0 : index
    %c0_0 = arith.constant 0 : index
    %0 = vector.load %arg2[%c0, %c0_0] : memref<16x36xf32, #tpu.memory_space<vmem>>, vector<16x36xf32>
    %c0_1 = arith.constant 0 : index
    %c0_2 = arith.constant 0 : index
    %c0_3 = arith.constant 0 : index
    %1 = vector.load %arg1[%c0_1, %c0_2, %c0_3] : memref<1x36x64xf32, #tpu.memory_space<vmem>>, vector<1x36x64xf32>
    %2 = vector.shape_cast %1 : vector<1x36x64xf32> to vector<36x64xf32>
    %cst = arith.constant dense<0.000000e+00> : vector<16x64xf32>
    %3 = tpu.matmul %0, %2, %cst {dimension_numbers = #tpu.dot_dimension_numbers<[1], [0], [0], [1], [0, 0, 1, 1], [], []>} : vector<16x36xf32>, vector<36x64xf32>, vector<16x64xf32> -> vector<16x64xf32>
    %c0_4 = arith.constant 0 : index
    %c0_5 = arith.constant 0 : index
    %4 = vector.load %arg3[%c0_4, %c0_5] : memref<16x11xf32, #tpu.memory_space<vmem>>, vector<16x1xf32>
    %c0_6 = arith.constant 0 : index
    %c1 = arith.constant 1 : index
    %5 = vector.load %arg3[%c0_6, %c1] : memref<16x11xf32, #tpu.memory_space<vmem>>, vector<16x1xf32>
    %c0_7 = arith.constant 0 : index
    %c2 = arith.constant 2 : index
    %6 = vector.load %arg3[%c0_7, %c2] : memref<16x11xf32, #tpu.memory_space<vmem>>, vector<16x1xf32>
    %c0_8 = arith.constant 0 : index
    %c3 = arith.constant 3 : index
    %7 = vector.load %arg3[%c0_8, %c3] : memref<16x11xf32, #tpu.memory_space<vmem>>, vector<16x8xf32>
    %8 = vector.broadcast %4 : vector<16x1xf32> to vector<16x64xf32>
    %9 = arith.addf %3, %8 : vector<16x64xf32>
    %cst_9 = arith.constant dense<0.000000e+00> : vector<16xf32>
    %10 = vector.multi_reduction <add>, %9, %cst_9 [1] : vector<16x64xf32> to vector<16xf32>
    %11 = vector.shape_cast %10 : vector<16xf32> to vector<16x1xf32>
    %12 = arith.mulf %9, %9 : vector<16x64xf32>
    %cst_10 = arith.constant dense<0.000000e+00> : vector<16xf32>
    %13 = vector.multi_reduction <add>, %12, %cst_10 [1] : vector<16x64xf32> to vector<16xf32>
    %14 = vector.shape_cast %13 : vector<16xf32> to vector<16x1xf32>
    %c0_11 = arith.constant 0 : index
    %c0_12 = arith.constant 0 : index
    %15 = vector.load %arg4[%c0_11, %c0_12] : memref<8x16xf32, #tpu.memory_space<vmem>>, vector<8x16xf32>
    %cst_13 = arith.constant dense<0.000000e+00> : vector<8x1xf32>
    %16 = tpu.matmul %15, %11, %cst_13 {dimension_numbers = #tpu.dot_dimension_numbers<[1], [0], [0], [1], [0, 0, 1, 1], [], []>} : vector<8x16xf32>, vector<16x1xf32>, vector<8x1xf32> -> vector<8x1xf32>
    %cst_14 = arith.constant 1.280000e+02 : f32
    %17 = vector.broadcast %cst_14 : f32 to vector<8x1xf32>
    %18 = arith.divf %16, %17 : vector<8x1xf32>
    %c0_15 = arith.constant 0 : index
    %c0_16 = arith.constant 0 : index
    %19 = vector.load %arg4[%c0_15, %c0_16] : memref<8x16xf32, #tpu.memory_space<vmem>>, vector<8x16xf32>
    %cst_17 = arith.constant dense<0.000000e+00> : vector<8x1xf32>
    %20 = tpu.matmul %19, %14, %cst_17 {dimension_numbers = #tpu.dot_dimension_numbers<[1], [0], [0], [1], [0, 0, 1, 1], [], []>} : vector<8x16xf32>, vector<16x1xf32>, vector<8x1xf32> -> vector<8x1xf32>
    %cst_18 = arith.constant 1.280000e+02 : f32
    %21 = vector.broadcast %cst_18 : f32 to vector<8x1xf32>
    %22 = arith.divf %20, %21 : vector<8x1xf32>
    %23 = arith.mulf %18, %18 : vector<8x1xf32>
    %24 = arith.subf %22, %23 : vector<8x1xf32>
    %cst_19 = arith.constant 0.000000e+00 : f32
    %25 = vector.broadcast %cst_19 : f32 to vector<8x1xf32>
    %26 = arith.maximumf %24, %25 : vector<8x1xf32>
    %cst_20 = arith.constant 9.99999974E-6 : f32
    %27 = vector.broadcast %cst_20 : f32 to vector<8x1xf32>
    %28 = arith.addf %26, %27 : vector<8x1xf32>
    %29 = math.rsqrt %28 : vector<8x1xf32>
    %cst_21 = arith.constant dense<0.000000e+00> : vector<16x1xf32>
    %30 = tpu.matmul %7, %18, %cst_21 {dimension_numbers = #tpu.dot_dimension_numbers<[1], [0], [0], [1], [0, 0, 1, 1], [], []>} : vector<16x8xf32>, vector<8x1xf32>, vector<16x1xf32> -> vector<16x1xf32>
    %cst_22 = arith.constant dense<0.000000e+00> : vector<16x1xf32>
    %31 = tpu.matmul %7, %29, %cst_22 {dimension_numbers = #tpu.dot_dimension_numbers<[1], [0], [0], [1], [0, 0, 1, 1], [], []>} : vector<16x8xf32>, vector<8x1xf32>, vector<16x1xf32> -> vector<16x1xf32>
    %32 = arith.mulf %31, %5 : vector<16x1xf32>
    %33 = arith.mulf %30, %32 : vector<16x1xf32>
    %34 = arith.subf %6, %33 : vector<16x1xf32>
    %35 = vector.broadcast %32 : vector<16x1xf32> to vector<16x64xf32>
    %36 = arith.mulf %9, %35 : vector<16x64xf32>
    %37 = vector.broadcast %34 : vector<16x1xf32> to vector<16x64xf32>
    %38 = arith.addf %36, %37 : vector<16x64xf32>
    %cst_23 = arith.constant 0.000000e+00 : f32
    %39 = vector.broadcast %cst_23 : f32 to vector<16x64xf32>
    %40 = arith.maximumf %38, %39 : vector<16x64xf32>
    %c0_24 = arith.constant 0 : index
    %c0_25 = arith.constant 0 : index
    %c0_26 = arith.constant 0 : index
    %41 = vector.load %arg5[%c0_24, %c0_25, %c0_26] : memref<1x16x64xf32, #tpu.memory_space<vmem>>, vector<1x16x64xf32>
    %42 = vector.shape_cast %41 : vector<1x16x64xf32> to vector<16x64xf32>
    %43 = vector.shape_cast %40 : vector<16x64xf32> to vector<1x16x64xf32>
    tpu.vector_store %arg5[%c0_24, %c0_25, %c0_26], %43 {strides = array<i32>} : memref<1x16x64xf32, #tpu.memory_space<vmem>>, vector<1x16x64xf32>,
    return
  }
  func.func @transform_0(%arg0: i32) -> (i32, i32, i32) {
    %c0_i32 = arith.constant 0 : i32
    %c0_i32_0 = arith.constant 0 : i32
    %c0_i32_1 = arith.constant 0 : i32
    return %arg0, %c0_i32, %c0_i32_0 : i32, i32, i32
  }
  func.func @transform_1(%arg0: i32) -> (i32, i32) {
    %c0_i32 = arith.constant 0 : i32
    %c0_i32_0 = arith.constant 0 : i32
    %c0_i32_1 = arith.constant 0 : i32
    return %c0_i32, %c0_i32_0 : i32, i32
  }
  func.func @transform_2(%arg0: i32) -> (i32, i32) {
    %c0_i32 = arith.constant 0 : i32
    %c0_i32_0 = arith.constant 0 : i32
    %c0_i32_1 = arith.constant 0 : i32
    return %c0_i32, %c0_i32_0 : i32, i32
  }
  func.func @transform_3(%arg0: i32) -> (i32, i32) {
    %c0_i32 = arith.constant 0 : i32
    %c0_i32_0 = arith.constant 0 : i32
    %c0_i32_1 = arith.constant 0 : i32
    return %c0_i32, %c0_i32_0 : i32, i32
  }
  func.func @transform_4(%arg0: i32) -> (i32, i32, i32) {
    %c0_i32 = arith.constant 0 : i32
    %c0_i32_0 = arith.constant 0 : i32
    %c0_i32_1 = arith.constant 0 : i32
    return %arg0, %c0_i32, %c0_i32_0 : i32, i32, i32
  }
}

</mosaic_0001>

<bundles_post_ra>
// kernel: tpu_custom_call.1
= control target key start
LH: loop header
LB: loop body
LE: loop exit
PB: predicated region body
PF: predicated region fallthrough
CT: control target
= control target key end

     0   :  { %9 = vsyncpa [#allocation3], 0  ;;  %s1136_s0 = inlined_call_operand.vmem [shape: f32[2,36,64], index: 0, kind: input, shape index: {}]   ;;  %s1137_s1 = inlined_call_operand.vmem [shape: f32[16,36], index: 1, kind: input, shape index: {}]   ;;  %s1138_s2 = inlined_call_operand.vmem [shape: f32[16,11], index: 2, kind: input, shape index: {}]   ;;  %s1139_s3 = inlined_call_operand.vmem [shape: f32[8,16], index: 3, kind: input, shape index: {}]   ;;  %s1140_s4 = inlined_call_operand.hbm [shape: f32[2,16,64], index: 4, kind: output, shape index: {}]  }
   0x1   :  { %11 = vsyncpa [#allocation3 + $0x1], 0  ;;  %s981_s15 = smov 0   ;;  %s983_s16 = smov 0  }
   0x2   :  { %s985_s17 = smov 0   ;;  %s987_s18 = smov 0  }
   0x3 LB: > { %s1002_s19 = sadd.s32 4294967295, %s944_s18   ;;  %s752_s20 = sadd.s32 4294967294, %s944_s18   ;;  %s944_s18 = sphi %s987_s18, %s1146_s18   ;;  %s940_s17 = sphi %s985_s17, %s1145_s17   ;;  %s936_s16 = sphi %s983_s16, %s1144_s16   ;;  %s932_s15 = sphi %s981_s15, %s1143_s15  }
   0x4   : > { %s1006_s21 = sadd.s32 1, %s944_s18   ;;  %s113_s22 = sadd.s32 1, %s940_s17 }
   0x5   : > { %s110_s23 = ssub.s32 %s944_s18, %s1006_s21  ;;  %p123_p0 = scmp.ne.s32.totalorder %s940_s17, %s936_s16 }
   0x6   : > { %p111_p1 = scmp.eq.s32.totalorder %s110_s23, 0  ;;  %p124_p2 = scmp.eq.s32.totalorder %s1002_s19, 1 }
   0x7   : > { %p129_p3 = scmp.ne.s32.totalorder %s936_s16, %s932_s15  ;;  %p130_p4 = scmp.eq.s32.totalorder %s752_s20, 1 }
   0x8   : > { %s1017_s24 = scalar_select %p111_p1, %s940_s17, %s113_s22  }
   0x9   : > { %p1019_p5 = por %p124_p2, %p123_p0  ;;  %p1023_p6 = por %p130_p4, %p129_p3 }
   0xa   : > { %p755_p7 = scmp.ge.s32.totalorder %s944_s18, 1  ;;  %p165_p8 = scmp.lt.s32.totalorder %s944_s18, 3 }
   0xc   : > { %p166_p9 = pnand %p755_p7, %p165_p8 }
   0xd   : > { %p191_p10 = scmp.lt.s32.totalorder (!%p166_p9), %s1002_s19, 1  ;;  %s949_s14 = smov (!%p166_p9), 125  }
   0xe   : > { %169 = sbr.rel (%p166_p9) target bundleno = 1057 (0x421), region = 36  ;;  %s950_s23 = smov (!%p166_p9), 127  }
   0xf   : > { %s952_s27 = smov (!%p166_p9), 2   ;;  %s188_s28 = sand.u32 (!%p166_p9), 1, %s936_s16  }
  0x10   : > { %s756_s29 = sshll.u32 (!%p166_p9), %s188_s28, 4  ;;  %s772_s6 = sshll.u32 (!%p166_p9), %s1002_s19, 8 }
  0x11   : > { %s190_s30 = scalar_lea.vmem (!%p166_p9), [#allocation2], %s756_s29  ;;  %s1093_s9 = scalar_lea.hbm (!%p166_p9), %s1140_s4, %s772_s6 }
  0x12   : > { %s1096_s10 = scalar_lea.sflag (!%p166_p9), [#allocation3], %s188_s28 }
  0x13   : > { %v196_v0 = vld [vmem:[%s1137_s1] sm:$0xff]  ;;  %vm215_vm0 = vcmask 293888   ;;  %v946_v1 = vmov 0   ;;  %v1037_v2 = vld [vmem:[%s1138_s2 + $0x8] sm:$0xff]  ;;  %s192_s5 = scalar_select %p191_p10, %s1002_s19, 1  ;;  %vm222_vm1 = vcmask 1043456  }
  0x14   : > { %802 = vmatprep.mubr.msk.f32.mxu0 %vm215_vm0, %v196_v0  ;;  %878 = vset.pattern.permute.xlu0 %v946_v1  ;;  %v1044_v3 = vld [vmem:[%s1138_s2] sm:$0xff]  ;;  %v197_v9 = vld [vmem:[%s1137_s1 + $0x8] sm:$0xff]  ;;  %v947_v10 = vmov 0.0   ;;  %vm301_vm2 = vcmask 523264   ;;  %vm948_vm3 = vmmov 0   ;;  %vm317_vm4 = vcmask 130048  }
  0x15   : > { %212 = vperm.xlu0 %878, %v1037_v2   ;;  %879 = vset.pattern.permute.xlu1 %v946_v1  ;;  %s829_s8 = smul.u32 40, %s192_s5  ;;  %v316_v24 = vld [vmem:[%s1139_s3] sm:$0xff]  ;;  %vm473_vm5 = vcmask 64512   ;;  %v951_v42 = vmov 2   ;;  %s690_s5 = sshll.u32 %s190_s30, 4  ;;  %s1088_s5 = int_to_ptr.vmem [resolvable:$true] %s690_s5 }
  0x16   : > { %805 = vmatprep.subr.mxu1 %v947_v10  ;;  %809 = vmatprep.mubr.msk.f32.mxu1 %vm948_vm3, %v947_v10  ;;  %s884_s19 = scalar_lea.vmem %s1088_s5, 256 }
  0x17   : > { %s195_s11 = scalar_lea.vmem %s1136_s0, %s829_s8  ;;  %p885_p11 = scmp.ne.s32.totalorder %s1088_s5, %s884_s19 }
  0x18   : > { %v202_v4 = vld [vmem:[%s195_s11 + $0x20] sm:$0xf]  ;;  %v201_v5 = vld [vmem:[%s195_s11 + $0x18] sm:$0xff]  ;;  %v200_v6 = vld [vmem:[%s195_s11 + $0x10] sm:$0xff] }
  0x19   : > { %207 = vperm.xlu0 %878, %v1044_v3   ;;  %792 = vmatprep.subr.msk.mxu0 %vm222_vm1, %v202_v4  ;;  %v199_v7 = vld [vmem:[%s195_s11 + $0x8] sm:$0xff]  ;;  %v198_v8 = vld [vmem:[%s195_s11] sm:$0xff]  ;;  %p886_p12 = pnand %p885_p11, %p1019_p5  ;;  %s953_s11 = smov [#allocation2]  }
  0x1a   : > { %793 = vmatpush3.msk.msra.mxu0 %vm222_vm1, %v202_v4  ;;  %s888_s12 = sshll.u32 %s953_s11, 4  ;;  %s889_s12 = int_to_ptr.vmem [resolvable:$false] %s888_s12 }
  0x1b   : > { %794 = vmatprep.subr.mxu0 %v201_v5  ;;  %p887_p13 = pneg %p886_p12  ;;  %s890_s13 = scalar_lea.vmem %s889_s12, 512 }
  0x1c   : > { %795 = vmatpush3.msra.mxu0 %v201_v5  ;;  %p891_p0 = scmp.lt.s32.totalorder %s1088_s5, %s889_s12  ;;  %p892_p1 = scmp.lt.s32.totalorder %s890_s13, %s884_s19 }
  0x1d   : > { %796 = vmatprep.subr.mxu0 %v200_v6  ;;  %881 = vset.pattern.permute.xlu0 %v951_v42 }
  0x1e   : > { %797 = vmatpush3.msra.mxu0 %v200_v6  ;;  %p893_p2 = por %p892_p1, %p891_p0 }
  0x1f   : > { %798 = vmatprep.subr.mxu0 %v199_v7 }
  0x20   : > { %799 = vmatpush3.msra.mxu0 %v199_v7  ;;  %p894_p3 = pnand %p893_p2, %p887_p13 }
  0x21   : > { %800 = vmatprep.subr.mxu0 %v198_v8 }
  0x22   : > { %801 = vmatpush3.msra.mxu0 %v198_v8 }
  0x23   : > { %803 = vmatmul.mubr.msk.f32.vlgmr.msra.gmra.mxu0 %vm215_vm0, %v197_v9 }
  0x90   : > { %v213_v11 = vpop.permute.xlu0 %212 }
  0x94   : > { %v208_v14 = vpop.permute.xlu0 %207 }
  0xe3   : > { %v804_v12 = vpop.f32.mrf.mxu0 }
  0xe4   : > { %v1054_v13 = vadd.f32 %v804_v12, %v213_v11 }
  0xe5   : > { %v292_v15 = vpop.f32.mrf.mxu0 }
  0xe6   : > { %v1056_v16 = vadd.f32 %v292_v15, %v208_v14  ;;  %v305_v17 = vsel %vm301_vm2, %v1054_v13, 0.0  ;;  %v309_v18 = vmul.f32 %v1054_v13, %v1054_v13 }
  0xe7   : > { %306 = vadd.xlane.f32.xlu1 %v305_v17 }
  0xe8   : > { %v313_v19 = vsel %vm301_vm2, %v309_v18, 0.0  ;;  %v302_v20 = vsel %vm301_vm2, %v1056_v16, 0.0  ;;  %v308_v21 = vmul.f32 %v1056_v16, %v1056_v16 }
  0xe9   : > { %314 = vadd.xlane.f32.xlu0 %v313_v19 }
  0xea   : > { %v310_v22 = vsel %vm301_vm2, %v308_v21, 0.0 }
  0xeb   : > { %303 = vadd.xlane.f32.xlu1 %v302_v20 }
  0xef   : > { %311 = vadd.xlane.f32.xlu1 %v310_v22 }
 0x100   : > { %469 = vrot.lane.b32.xlu1 %v1044_v3, %s949_s14 }
 0x104   : > { %471 = vrot.lane.b32.xlu1 %v1037_v2, %s949_s14 }
 0x108   : > { %628 = vrot.lane.b32.xlu1 %v1044_v3, %s950_s23 }
 0x10c   : > { %630 = vrot.lane.b32.xlu1 %v1037_v2, %s950_s23 }
 0x170   : > { %v307_v23 = vpop.xlane.xlu1 %306 }
 0x171   : > { %806 = vmatpush3.msra.mxu1 %v307_v23 }
 0x172   : > { %807 = vmatprep.subr.mxu1 %v947_v10  ;;  %v315_v26 = vpop.xlane.xlu0 %314 }
 0x174   : > { %v304_v25 = vpop.xlane.xlu1 %303 }
 0x175   : > { %808 = vmatpush3.msra.mxu1 %v304_v25 }
 0x176   : > { %810 = vmatmul.mubr.msk.f32.vlgmr.msra.gmra.mxu1 %vm317_vm4, %v316_v24  ;;  %812 = vmatprep.subr.mxu1 %v947_v10 }
 0x177   : > { %813 = vmatpush3.msra.mxu1 %v315_v26  ;;  %816 = vmatprep.mubr.msk.f32.mxu1 %vm948_vm3, %v947_v10 }
 0x178   : > { %814 = vmatprep.subr.mxu1 %v947_v10  ;;  %v312_v27 = vpop.xlane.xlu1 %311 }
 0x179   : > { %815 = vmatpush3.msra.mxu1 %v312_v27 }
 0x17a   : > { %817 = vmatmul.mubr.msk.f32.vlgmr.msra.gmra.mxu1 %vm317_vm4, %v316_v24 }
 0x17c   : > { %v470_v28 = vpop.permute.xlu1 %469 }
 0x17d   : > { %821 = vmatprep.mubr.msk.f32.mxu1 %vm473_vm5, %v470_v28  ;;  %826 = vmatprep.mubr.msk.f32.mxu0 %vm473_vm5, %v470_v28 }
 0x180   : > { %v472_v32 = vpop.permute.xlu1 %471 }
 0x184   : > { %v629_v41 = vpop.permute.xlu1 %628 }
 0x188   : > { %v631_v43 = vpop.permute.xlu1 %630 }
 0x236   : > { %v387_v29 = vpop.f32.mrf.mxu1 }
 0x237   : > { %v392_v30 = vmul.f32 0.0078125, %v387_v29 }
 0x238   : > { %v811_v31 = vpop.f32.mrf.mxu1 }
 0x239   : > { %819 = vmatprep.subr.mxu1 %v392_v30  ;;  %v464_v35 = vmul.f32 %v392_v30, %v392_v30 }
 0x23a   : > { %v459_v33 = vpop.f32.mrf.mxu1  ;;  %820 = vmatpush3.msra.mxu1 %v392_v30 }
 0x23b   : > { %v463_v34 = vmul.f32 0.0078125, %v459_v33  ;;  %822 = vmatmul.mubr.msk.f32.vlgmr.msra.gmra.mxu1 %vm473_vm5, %v472_v32 }
 0x23c   : > { %v818_v36 = vpop.f32.mrf.mxu1 }
 0x23d   : > { %v465_v37 = vsub.f32 %v463_v34, %v464_v35 }
 0x23f   : > { %v466_v38 = vmax.f32 %v465_v37, 0.0 }
 0x241   : > { %v467_v39 = vadd.f32 1e-05, %v466_v38 }
 0x243   : > { %882 = vrsqrt.f32 %v467_v39 }
 0x250   : > { %v883_v40 = vpop.eup %882 }
 0x251   : > { %824 = vmatprep.subr.mxu0 %v883_v40 }
 0x252   : > { %825 = vmatpush3.msra.mxu0 %v883_v40 }
 0x253   : > { %827 = vmatmul.mubr.msk.f32.vlgmr.msra.gmra.mxu0 %vm473_vm5, %v472_v32 }
 0x2fb   : > { %v823_v45 = vpop.f32.mrf.mxu1 }
 0x2fd   : > { %v544_v50 = vpop.f32.mrf.mxu1 }
 0x313   : > { %v828_v44 = vpop.f32.mrf.mxu0 }
 0x314   : > { %v635_v46 = vmul.f32 %v828_v44, %v631_v43 }
 0x315   : > { %v619_v47 = vpop.f32.mrf.mxu0 }
 0x316   : > { %v637_v48 = vmul.f32 %v823_v45, %v635_v46  ;;  %v634_v49 = vmul.f32 %v629_v41, %v619_v47 }
 0x318   : > { %v636_v51 = vmul.f32 %v634_v49, %v544_v50  ;;  %642 = vrot.lane.b32.xlu1 %v637_v48, %s952_s27 }
 0x31a   : > { %640 = vrot.lane.b32.xlu0 %v636_v51, %s952_s27 }
 0x31c   : > { %650 = vperm.xlu1 %879, %v634_v49  }
 0x320   : > { %655 = vperm.xlu1 %879, %v635_v46  }
 0x324   : > { %880 = vset.pattern.permute.xlu1 %v951_v42 }
 0x38a   : > { %v643_v54 = vpop.permute.xlu1 %642 }
 0x38b   : > { %v647_v55 = vsub.f32 %v1037_v2, %v643_v54 }
 0x38c   : > { %v641_v52 = vpop.permute.xlu0 %640 }
 0x38d   : > { %v646_v53 = vsub.f32 %v1044_v3, %v641_v52 }
 0x38f   : > { %662 = vperm.xlu1 %880, %v646_v53  }
 0x393   : > { %667 = vperm.xlu1 %880, %v647_v55  }
 0x397   : > { %v651_v56 = vpop.permute.xlu1 %650 }
 0x398   : > { %v658_v58 = vmul.f32 %v651_v56, %v1056_v16 }
 0x39b   : > { %v656_v57 = vpop.permute.xlu1 %655 }
 0x39c   : > { %v659_v61 = vmul.f32 %v656_v57, %v1054_v13 }
 0x40a   : > { %v663_v59 = vpop.permute.xlu1 %662 }
 0x40b   : > { %v670_v60 = vadd.f32 %v663_v59, %v658_v58 }
 0x40d   : > { %v672_v62 = vmax.f32 %v670_v60, 0.0 }
 0x40e   : > { %v668_v63 = vpop.permute.xlu1 %667 }
 0x40f   : > { %674 = vst.msk [vmem:[%s190_s30] sm:$0xff] %vm301_vm2, %v672_v62  ;;  %v671_v0 = vadd.f32 %v668_v63, %v659_v61 }
 0x411   : > { %v673_v1 = vmax.f32 %v671_v0, 0.0 }
 0x413   : > { %675 = vst.msk [vmem:[%s190_s30 + $0x8] sm:$0xff] %vm301_vm2, %v673_v1 }
 0x414   : > { %897 = shalt.err (!%p894_p3)
}
 0x415   : > { %s898_s14 = scalar_lea.hbm %s1093_s9, 256  ;;  %s902_s23 = scalar_lea.hbm %s1140_s4, 512 }
 0x416   : > { %p899_p4 = scmp.ne.s32.totalorder %s1093_s9, %s898_s14  ;;  %p903_p9 = scmp.lt.s32.totalorder %s1093_s9, %s1140_s4 }
 0x417   : > { %p904_p10 = scmp.lt.s32.totalorder %s902_s23, %s898_s14 }
 0x418   : > { %p900_p7 = pnand %p899_p4, %p1019_p5 }
 0x419   : > { %p905_p11 = por %p904_p10, %p903_p9 }
 0x41a   : > { %p901_p8 = pneg %p900_p7 }
 0x41c   : > { %p906_p12 = pnand %p905_p11, %p901_p8 }
 0x41e   : > { %909 = shalt.err (!%p906_p12)
}
 0x41f   : > { %s954_s29 = smov 128   ;;  %s955_s30 = smov 8  }
 0x420   : > { %830 = dma.vmem_to_hbm [thread:$0]  (%p1019_p5), %s1088_s5, 256, %s1093_s9, %s1096_s10, %s954_s29, %s954_s29, %s955_s30  }
 0x421 PF: > { %p836_p13 = scmp.ge.s32.totalorder %s944_s18, 2  ;;  %s705_s6 = sand.u32 1, %s932_s15  }
 0x422   : > { %s706_s7 = scalar_lea.sflag [#allocation3], %s705_s6 }
 0x423   : > { %p833_p0 = pnand %p836_p13, %p1023_p6 }
 0x425   : > { %p834_p1 = pneg %p833_p0 }
 0x427   : > { %927 = dma.done.wait (%p834_p1), %s706_s7, 256  }
 0x428   : > { %929 = vsyncadd (%p834_p1), %s706_s7, 4294967040  ;;  %p14_p2 = scmp.ge.s32.totalorder %s1006_s21, 4   ;;  %s1143_s15 = smov %s936_s16 }
 0x429   : > { %s1144_s16 = smov %s940_s17  ;;  %s1145_s17 = smov %s1017_s24 }
 0x42a   : > { %s1146_s18 = smov %s1006_s21  ;;  %16 = sbr.rel (!%p14_p2) target bundleno = 3 (0x3), region = 71 }
 0x42f   :  { %711 = vsyncpa [#allocation3], 1 }
 0x430   :  { %713 = vsyncpa [#allocation3 + $0x1], 1 }

</bundles_post_ra>
